<compile_context>
chip_gen: v5e
topology: v5e:2x2
jax: 0.10.0
libtpu: 0.0.40
codegen_flags: <defaults>
</compile_context>

<pallas_src>
import functools

import jax
import jax.numpy as jnp
from jax.experimental import pallas as pl
from jax.experimental.pallas import tpu as pltpu

IN_F = 8                 # input features  (Linear(8, 16))
HID = 16                 # hidden units
GROUP = 16               # samples packed per 128-lane row (GROUP * IN_F == 128)
LANES = GROUP * IN_F     # 128
HID_BIG = GROUP * HID    # 256

MIN_TILE_ROWS = 512      # below this, splitting tiles only adds per-step overhead


def _cdiv(a, b):
    return (a + b - 1) // b


def _round_up(x, m):
    return ((x + m - 1) // m) * m


def _mlp_kernel(z_ref, w1b_ref, b1b_ref, w2b_ref, b2_ref, out_ref):
    # z_ref  : (TM, 128)  -- 16 samples x 8 features interleaved per row
    # w1b_ref: (128, 256) -- block-diagonal kron(I16, fc0.weight^T)
    # b1b_ref: (1, 256)   -- fc0.bias tiled 16x
    # w2b_ref: (256, 16)  -- block-diagonal kron(I16, fc2.weight^T)
    # b2_ref : (1, 1)
    # out_ref: (TM, 16)   -- out[r, s] == prediction for sample r*16 + s
    z = z_ref[...].astype(jnp.float32)                                   # bf16 z OK
    h = jnp.dot(z, w1b_ref[...], preferred_element_type=jnp.float32)     # MXU
    h = jnp.maximum(h + b1b_ref[...], 0.0)                               # VPU
    o = jnp.dot(h, w2b_ref[...], preferred_element_type=jnp.float32)     # MXU
    out_ref[...] = (o + b2_ref[...]).astype(out_ref.dtype)


@functools.partial(jax.jit, static_argnames=("tile_rows_max",))
def latent_predictor_x9(z, w1, b1, w2, b2, *, tile_rows_max=2048):
    """Forward pass. z: (N, 8) (f32 or bf16) -> (N, 1) f32.

    w1: (16, 8), b1: (16,), w2: (1, 16), b2: (1,)  (PyTorch nn.Linear layout).
    """
    n = z.shape[0]
    assert z.shape[1] == IN_F, z.shape

    # Pack 16 samples per 128-lane row.  Zero-copy reshape when N % 16 == 0;
    # otherwise pad at most 15 samples (the only wrapper-side HBM copy).
    n_pad = _round_up(n, GROUP)
    if n_pad != n:
        z = jnp.pad(z, ((0, n_pad - n), (0, 0)))
    rows = n_pad // GROUP
    zr = z.reshape(rows, LANES)

    # Block-diagonal weights so both layers are lane-dense MXU matmuls on the
    # interleaved layout.  Tiny one-time construction; resident across the grid.
    eye = jnp.eye(GROUP, dtype=jnp.float32)
    w1_big = jnp.kron(eye, w1.T.astype(jnp.float32))                    # (128, 256)
    b1_big = jnp.tile(b1.astype(jnp.float32), GROUP).reshape(1, HID_BIG)
    w2_big = jnp.kron(eye, w2.reshape(1, HID).T.astype(jnp.float32))    # (256, 16)
    b2_m = b2.reshape(1, 1).astype(jnp.float32)

    # Tile sizing: large tiles amortize the ~0.35us/step grid overhead; halve
    # for large N so the "parallel" axis gives >=2 blocks (both v7x TCs).
    tm = min(tile_rows_max, max(MIN_TILE_ROWS, _cdiv(rows, 2)))
    tm = min(_round_up(tm, 8), _round_up(rows, 8))
    grid = (_cdiv(rows, tm),)

    flops = 2 * rows * (LANES * HID_BIG + HID_BIG * GROUP)
    bytes_accessed = (
        rows * LANES * zr.dtype.itemsize
        + rows * GROUP * 4
        + 4 * (LANES * HID_BIG + HID_BIG + HID_BIG * GROUP + 1)
    )

    out = pl.pallas_call(
        _mlp_kernel,
        out_shape=jax.ShapeDtypeStruct((rows, GROUP), jnp.float32),
        grid=grid,
        in_specs=[
            pl.BlockSpec((tm, LANES), lambda i: (i, 0)),        # batch tiles (lane-dense)
            pl.BlockSpec((LANES, HID_BIG), lambda i: (0, 0)),   # weights stay resident
            pl.BlockSpec((1, HID_BIG), lambda i: (0, 0)),
            pl.BlockSpec((HID_BIG, GROUP), lambda i: (0, 0)),
            pl.BlockSpec((1, 1), lambda i: (0, 0)),
        ],
        out_specs=pl.BlockSpec((tm, GROUP), lambda i: (i, 0)),
        compiler_params=pltpu.CompilerParams(
            dimension_semantics=("parallel",),                  # shard tiles across TCs (v7x)
            vmem_limit_bytes=32 * 1024 * 1024,
        ),
        cost_estimate=pl.CostEstimate(
            flops=flops, transcendentals=0, bytes_accessed=bytes_accessed
        ),
    )(zr, w1_big, b1_big, w2_big, b2_m)

    # (rows, 16) -> (n_pad, 1) is a contiguous (zero-copy) reshape; drop the pad.
    return out.reshape(n_pad, 1)[:n]


def init_params(key):
    """Deterministic init mirroring PyTorch nn.Linear defaults (U[-1/sqrt(fan_in), +])."""
    k1, k2, k3, k4 = jax.random.split(key, 4)
    bound1 = 1.0 / jnp.sqrt(float(IN_F))
    bound2 = 1.0 / jnp.sqrt(float(HID))
    w1 = jax.random.uniform(k1, (HID, IN_F), jnp.float32, -bound1, bound1)  # fc[0].weight
    b1 = jax.random.uniform(k2, (HID,), jnp.float32, -bound1, bound1)       # fc[0].bias
    w2 = jax.random.uniform(k3, (1, HID), jnp.float32, -bound2, bound2)     # fc[2].weight
    b2 = jax.random.uniform(k4, (1,), jnp.float32, -bound2, bound2)         # fc[2].bias
    return w1, b1, w2, b2


def reference_forward(z, w1, b1, w2, b2):
    """Pure-JAX reference matching PyTorch semantics: x @ W.T + b."""
    h = jnp.maximum(z @ w1.T + b1, 0.0)
    return h @ w2.T + b2


if __name__ == "__main__":
    key = jax.random.PRNGKey(0)
    k_params, k_z1, k_z2 = jax.random.split(key, 3)
    w1, b1, w2, b2 = init_params(k_params)

    # Small batches: one multiple of 16 (zero-copy packing) and one ragged size
    # (exercises the tiny pad + partial-block path).
    for k_z, n in ((k_z1, 16), (k_z2, 21)):
        z = jax.random.normal(k_z, (n, IN_F), jnp.float32)
        out = jax.block_until_ready(latent_predictor_x9(z, w1, b1, w2, b2))
        ref = reference_forward(z, w1, b1, w2, b2)
        assert out.shape == (n, 1), out.shape
        # Tolerance also covers a single-pass-bf16 MXU lowering of the f32 dots;
        # with full-f32 MXU passes the error is ~1e-6.
        assert jnp.allclose(out, ref, atol=2e-2, rtol=2e-2), (out, ref)

    print("KERNEL_OK")
</pallas_src>

<mosaic_0001>
module attributes {stable_mosaic.version = 11 : i64} {
  func.func @_mlp_kernel(%arg0: i32, %arg1: memref<8x128xf32, #tpu.memory_space<vmem>>, %arg2: memref<128x256xf32, #tpu.memory_space<vmem>>, %arg3: memref<1x256xf32, #tpu.memory_space<vmem>>, %arg4: memref<256x16xf32, #tpu.memory_space<vmem>>, %arg5: memref<1x1xf32, #tpu.memory_space<vmem>>, %arg6: memref<8x16xf32, #tpu.memory_space<vmem>>) attributes {dimension_semantics = [#tpu.dimension_semantics<parallel>], iteration_bounds = array<i64: 1>, scalar_prefetch = 0 : i64, scratch_operands = 0 : i64, tpu.core_type = #tpu.core_type<tc>, window_params = [{transform_indices = @transform_0, window_bounds = array<i64: 8, 128>}, {pipeline_mode = #tpu.pipeline_mode<synchronous>, transform_indices = @transform_1, window_bounds = array<i64: 128, 256>}, {pipeline_mode = #tpu.pipeline_mode<synchronous>, transform_indices = @transform_2, window_bounds = array<i64: 1, 256>}, {pipeline_mode = #tpu.pipeline_mode<synchronous>, transform_indices = @transform_3, window_bounds = array<i64: 256, 16>}, {pipeline_mode = #tpu.pipeline_mode<synchronous>, transform_indices = @transform_4, window_bounds = array<i64: 1, 1>}, {transform_indices = @transform_5, window_bounds = array<i64: 8, 16>}]} {
    %c0 = arith.constant 0 : index
    %c0_0 = arith.constant 0 : index
    %0 = vector.load %arg1[%c0, %c0_0] : memref<8x128xf32, #tpu.memory_space<vmem>>, vector<8x128xf32>
    %c0_1 = arith.constant 0 : index
    %c0_2 = arith.constant 0 : index
    %1 = vector.load %arg2[%c0_1, %c0_2] : memref<128x256xf32, #tpu.memory_space<vmem>>, vector<128x256xf32>
    %cst = arith.constant dense<0.000000e+00> : vector<8x256xf32>
    %2 = tpu.matmul %0, %1, %cst {dimension_numbers = #tpu.dot_dimension_numbers<[1], [0], [0], [1], [0, 0, 1, 1], [], []>} : vector<8x128xf32>, vector<128x256xf32>, vector<8x256xf32> -> vector<8x256xf32>
    %c0_3 = arith.constant 0 : index
    %c0_4 = arith.constant 0 : index
    %3 = vector.load %arg3[%c0_3, %c0_4] : memref<1x256xf32, #tpu.memory_space<vmem>>, vector<1x256xf32>
    %4 = vector.broadcast %3 : vector<1x256xf32> to vector<8x256xf32>
    %5 = arith.addf %2, %4 : vector<8x256xf32>
    %cst_5 = arith.constant 0.000000e+00 : f32
    %6 = vector.broadcast %cst_5 : f32 to vector<8x256xf32>
    %7 = arith.maximumf %5, %6 : vector<8x256xf32>
    %c0_6 = arith.constant 0 : index
    %c0_7 = arith.constant 0 : index
    %8 = vector.load %arg4[%c0_6, %c0_7] : memref<256x16xf32, #tpu.memory_space<vmem>>, vector<256x16xf32>
    %cst_8 = arith.constant dense<0.000000e+00> : vector<8x16xf32>
    %9 = tpu.matmul %7, %8, %cst_8 {dimension_numbers = #tpu.dot_dimension_numbers<[1], [0], [0], [1], [0, 0, 1, 1], [], []>} : vector<8x256xf32>, vector<256x16xf32>, vector<8x16xf32> -> vector<8x16xf32>
    %c0_9 = arith.constant 0 : index
    %c0_10 = arith.constant 0 : index
    %10 = vector.load %arg5[%c0_9, %c0_10] : memref<1x1xf32, #tpu.memory_space<vmem>>, vector<1x1xf32>
    %11 = vector.broadcast %10 : vector<1x1xf32> to vector<8x16xf32>
    %12 = arith.addf %9, %11 : vector<8x16xf32>
    %c0_11 = arith.constant 0 : index
    %c0_12 = arith.constant 0 : index
    %13 = vector.load %arg6[%c0_11, %c0_12] : memref<8x16xf32, #tpu.memory_space<vmem>>, vector<8x16xf32>
    tpu.vector_store %arg6[%c0_11, %c0_12], %12 {strides = array<i32>} : memref<8x16xf32, #tpu.memory_space<vmem>>, vector<8x16xf32>,
    return
  }
  func.func @transform_0(%arg0: i32) -> (i32, i32) {
    %c0_i32 = arith.constant 0 : i32
    %c0_i32_0 = arith.constant 0 : i32
    return %arg0, %c0_i32 : i32, i32
  }
  func.func @transform_1(%arg0: i32) -> (i32, i32) {
    %c0_i32 = arith.constant 0 : i32
    %c0_i32_0 = arith.constant 0 : i32
    %c0_i32_1 = arith.constant 0 : i32
    return %c0_i32, %c0_i32_0 : i32, i32
  }
  func.func @transform_2(%arg0: i32) -> (i32, i32) {
    %c0_i32 = arith.constant 0 : i32
    %c0_i32_0 = arith.constant 0 : i32
    %c0_i32_1 = arith.constant 0 : i32
    return %c0_i32, %c0_i32_0 : i32, i32
  }
  func.func @transform_3(%arg0: i32) -> (i32, i32) {
    %c0_i32 = arith.constant 0 : i32
    %c0_i32_0 = arith.constant 0 : i32
    %c0_i32_1 = arith.constant 0 : i32
    return %c0_i32, %c0_i32_0 : i32, i32
  }
  func.func @transform_4(%arg0: i32) -> (i32, i32) {
    %c0_i32 = arith.constant 0 : i32
    %c0_i32_0 = arith.constant 0 : i32
    %c0_i32_1 = arith.constant 0 : i32
    return %c0_i32, %c0_i32_0 : i32, i32
  }
  func.func @transform_5(%arg0: i32) -> (i32, i32) {
    %c0_i32 = arith.constant 0 : i32
    %c0_i32_0 = arith.constant 0 : i32
    return %arg0, %c0_i32 : i32, i32
  }
}

</mosaic_0001>

<bundles_post_ra>
// kernel: tile.9
= control target key start
LH: loop header
LB: loop body
LE: loop exit
PB: predicated region body
PF: predicated region fallthrough
CT: control target
= control target key end

     0   :  { %s7_s6 = smov 3  ;;  %s21_s9 = smov 3  ;;  %vm4_vm0 = vcmask 130048   ;;  %vm11_vm1 = vcmask 1048448   ;;  %vm18_vm2 = vcmask 917248   ;;  %vm25_vm3 = vcmask 786048   ;;  %s129_s0 = inlined_call_operand.vmem [shape: f32[16,16], index: 0, kind: input, shape index: {}]   ;;  %s130_s1 = inlined_call_operand.vmem [shape: f32[1,256], index: 1, kind: output, shape index: {}]  }
   0x1   :  { %v67_v0 = vld [vmem:[%s129_s0 + $0x7] ss:$8 sm:%s7_s6]   ;;  %s82_s10 = smov 112   ;;  %v69_v1 = vld [vmem:[%s129_s0 + $0x5] ss:$8 sm:%s21_s9]   ;;  %s83_s13 = smov 80  }
   0x2   :  { %9 = vrot.lane.b32.xlu0 %v67_v0, %s82_s10  ;;  %23 = vrot.lane.b32.xlu1 %v69_v1, %s83_s13  ;;  %s14_s14 = smov 3  ;;  %s28_s15 = smov 3  ;;  %vm32_vm4 = vcmask 654848   ;;  %vm39_vm5 = vcmask 523648   ;;  %vm46_vm6 = vcmask 392448   ;;  %vm53_vm7 = vcmask 261248  }
   0x3   :  { %s35_s16 = smov 3  ;;  %v68_v3 = vld [vmem:[%s129_s0 + $0x6] ss:$8 sm:%s14_s14]   ;;  %s84_s21 = smov 48   ;;  %v70_v4 = vld [vmem:[%s129_s0 + $0x4] ss:$8 sm:%s28_s15]  }
   0x4   :  { %v71_v2 = vld [vmem:[%s129_s0 + $0x3] ss:$8 sm:%s35_s16]   ;;  %s42_s24 = smov 3  ;;  %s85_s25 = smov 96  }
   0x5   :  { %37 = vrot.lane.b32.xlu2 %v71_v2, %s84_s21  ;;  %s86_s26 = smov 64   ;;  %s49_s27 = smov 3  ;;  %v72_v5 = vld [vmem:[%s129_s0 + $0x2] ss:$8 sm:%s42_s24]  }
   0x6   :  { %v73_v6 = vld [vmem:[%s129_s0 + $0x1] ss:$8 sm:%s49_s27]   ;;  %s87_s3 = smov 32   ;;  %s88_s4 = smov 16  }
   0x7   :  { %s2_s5 = smov 3 }
   0x8   :  { %v3_v7 = vld [vmem:[%s129_s0] ss:$8 sm:%s2_s5]  }
   0x9   :  { %5 = vst.msk [vmem:[#allocation0] ss:$8 sm:$0x3] %vm4_vm0, %v3_v7  }
   0xa   :  { %16 = vrot.lane.b32.xlu0 %v68_v3, %s85_s25  ;;  %30 = vrot.lane.b32.xlu1 %v70_v4, %s86_s26 }
   0xd   :  { %44 = vrot.lane.b32.xlu2 %v72_v5, %s87_s3 }
  0x12   :  { %51 = vrot.lane.b32.xlu0 %v73_v6, %s88_s4 }
  0x5f   :  { %v38_v8 = vpop.permute.xlu2 %37  }
  0x67   :  { %v45_v9 = vpop.permute.xlu2 %44  }
  0x74   :  { %v10_v10 = vpop.permute.xlu0 %9   ;;  %v24_v11 = vpop.permute.xlu1 %23  }
  0x75   :  { %12 = vst.msk [vmem:[#allocation0] ss:$8 sm:$0x3] %vm11_vm1, %v10_v10  }
  0x7c   :  { %v17_v12 = vpop.permute.xlu0 %16   ;;  %v31_v13 = vpop.permute.xlu1 %30  }
  0x7d   :  { %19 = vst.msk [vmem:[#allocation0] ss:$8 sm:$0x3] %vm18_vm2, %v17_v12  }
  0x7e   :  { %26 = vst.msk [vmem:[#allocation0] ss:$8 sm:$0x3] %vm25_vm3, %v24_v11  }
  0x7f   :  { %33 = vst.msk [vmem:[#allocation0] ss:$8 sm:$0x3] %vm32_vm4, %v31_v13  }
  0x80   :  { %40 = vst.msk [vmem:[#allocation0] ss:$8 sm:$0x3] %vm39_vm5, %v38_v8  }
  0x81   :  { %47 = vst.msk [vmem:[#allocation0] ss:$8 sm:$0x3] %vm46_vm6, %v45_v9  }
  0x84   :  { %v52_v14 = vpop.permute.xlu0 %51  }
  0x85   :  { %54 = vst.msk [vmem:[#allocation0] ss:$8 sm:$0x3] %vm53_vm7, %v52_v14  }
  0x8c   :  { %v57_v15 = vld [vmem:[#allocation0] sm:$0x1]  ;;  %v62_v16 = vld [vmem:[#allocation0 + $0x8] sm:$0x1] }
  0x8d   :  { %60 = vst [vmem:[%s130_s1] sm:$0x1] %v57_v15 }
  0x8e   :  { %74 = vst [vmem:[%s130_s1 + $0x1] sm:$0x1] %v62_v16 }

// kernel: latent_predictor_x9.1
= control target key start
LH: loop header
LB: loop body
LE: loop exit
PB: predicated region body
PF: predicated region fallthrough
CT: control target
= control target key end

     0   :  { %s473_s0 = inlined_call_operand.vmem [shape: f32[1,128], index: 0, kind: input, shape index: {}]   ;;  %s474_s1 = inlined_call_operand.vmem [shape: f32[128,256], index: 1, kind: input, shape index: {}]   ;;  %s475_s2 = inlined_call_operand.vmem [shape: f32[1,256], index: 2, kind: input, shape index: {}]   ;;  %s476_s3 = inlined_call_operand.vmem [shape: f32[256,16], index: 3, kind: input, shape index: {}]   ;;  %s477_s4 = inlined_call_operand.<no memory space> [shape: f32[1,1], index: 4, kind: input, shape index: {}]   ;;  %s478_s5 = inlined_call_operand.hbm [shape: f32[1,16], index: 5, kind: output, shape index: {}]  }
   0x1   :  { %v10_v0 = vstv %s477_s4 }
   0x2   :  { %11 = vst [vmem:[#allocation2] sm:$0x1] %v10_v0 }
   0x3   :  { %12 = vsyncpa [#allocation4], 0  ;;  %v54_v1 = vld [vmem:[%s474_s1 + $0xf0] sm:$0xff]  ;;  %v52_v2 = vld [vmem:[%s474_s1 + $0xe0] sm:$0xff]  ;;  %vm183_vm0 = vcmask 130048  }
   0x4   :  { %62 = vmatpush.msra.mxu0 %v54_v1  ;;  %v55_v3 = vld [vmem:[%s474_s1 + $0xf8] sm:$0xff]  ;;  %v53_v4 = vld [vmem:[%s474_s1 + $0xe8] sm:$0xff]  ;;  %v50_v5 = vld [vmem:[%s474_s1 + $0xd0] sm:$0xff] }
   0x5   :  { %82 = vmatpush.msra.mxu1 %v55_v3  ;;  %v51_v6 = vld [vmem:[%s474_s1 + $0xd8] sm:$0xff]  ;;  %v48_v7 = vld [vmem:[%s474_s1 + $0xc0] sm:$0xff]  ;;  %v49_v8 = vld [vmem:[%s474_s1 + $0xc8] sm:$0xff]  ;;  %v235_v3 = vmov 0  }
   0x6   :  { %63 = vmatpush.msra.mxu0 %v52_v2  ;;  %v46_v9 = vld [vmem:[%s474_s1 + $0xb0] sm:$0xff]  ;;  %v47_v10 = vld [vmem:[%s474_s1 + $0xb8] sm:$0xff]  ;;  %v44_v11 = vld [vmem:[%s474_s1 + $0xa0] sm:$0xff]  ;;  %207 = vset.pattern.permute.xlu0 %v235_v3 }
   0x7   :  { %83 = vmatpush.msra.mxu1 %v53_v4  ;;  %v45_v12 = vld [vmem:[%s474_s1 + $0xa8] sm:$0xff]  ;;  %v42_v13 = vld [vmem:[%s474_s1 + $0x90] sm:$0xff]  ;;  %v43_v14 = vld [vmem:[%s474_s1 + $0x98] sm:$0xff] }
   0x8   :  { %64 = vmatpush.msra.mxu0 %v50_v5  ;;  %v119_v15 = vld [vmem:[%s476_s3 + $0x78] sm:$0xff]  ;;  %v118_v16 = vld [vmem:[%s476_s3 + $0x70] sm:$0xff]  ;;  %v40_v17 = vld [vmem:[%s474_s1 + $0x80] sm:$0xff] }
   0x9   :  { %84 = vmatpush.msra.mxu1 %v51_v6  ;;  %143 = vmatpush.msra.mxu2 %v119_v15  ;;  %v135_v18 = vld [vmem:[%s476_s3 + $0xf8] sm:$0xff]  ;;  %v134_v19 = vld [vmem:[%s476_s3 + $0xf0] sm:$0xff]  ;;  %v41_v20 = vld [vmem:[%s474_s1 + $0x88] sm:$0xff] }
   0xa   :  { %65 = vmatpush.msra.mxu0 %v48_v7  ;;  %163 = vmatpush.msra.mxu3 %v135_v18  ;;  %v117_v21 = vld [vmem:[%s476_s3 + $0x68] sm:$0xff]  ;;  %v38_v22 = vld [vmem:[%s474_s1 + $0x70] sm:$0xff]  ;;  %v39_v24 = vld [vmem:[%s474_s1 + $0x78] sm:$0xff] }
   0xb   :  { %85 = vmatpush.msra.mxu1 %v49_v8  ;;  %144 = vmatpush.msra.mxu2 %v118_v16  ;;  %v133_v23 = vld [vmem:[%s476_s3 + $0xe8] sm:$0xff]  ;;  %v116_v25 = vld [vmem:[%s476_s3 + $0x60] sm:$0xff]  ;;  %v115_v29 = vld [vmem:[%s476_s3 + $0x58] sm:$0xff] }
   0xc   :  { %66 = vmatpush.msra.mxu0 %v46_v9  ;;  %164 = vmatpush.msra.mxu3 %v134_v19  ;;  %v36_v26 = vld [vmem:[%s474_s1 + $0x60] sm:$0xff]  ;;  %v37_v28 = vld [vmem:[%s474_s1 + $0x68] sm:$0xff]  ;;  %v34_v30 = vld [vmem:[%s474_s1 + $0x50] sm:$0xff] }
   0xd   :  { %86 = vmatpush.msra.mxu1 %v47_v10  ;;  %145 = vmatpush.msra.mxu2 %v117_v21  ;;  %v132_v27 = vld [vmem:[%s476_s3 + $0xe0] sm:$0xff]  ;;  %v131_v31 = vld [vmem:[%s476_s3 + $0xd8] sm:$0xff]  ;;  %v114_v33 = vld [vmem:[%s476_s3 + $0x50] sm:$0xff] }
   0xe   :  { %67 = vmatpush.msra.mxu0 %v44_v11  ;;  %165 = vmatpush.msra.mxu3 %v133_v23  ;;  %v35_v32 = vld [vmem:[%s474_s1 + $0x58] sm:$0xff]  ;;  %v32_v34 = vld [vmem:[%s474_s1 + $0x40] sm:$0xff]  ;;  %v130_v35 = vld [vmem:[%s476_s3 + $0xd0] sm:$0xff] }
   0xf   :  { %87 = vmatpush.msra.mxu1 %v45_v12  ;;  %146 = vmatpush.msra.mxu2 %v116_v25  ;;  %v33_v36 = vld [vmem:[%s474_s1 + $0x48] sm:$0xff]  ;;  %v30_v38 = vld [vmem:[%s474_s1 + $0x30] sm:$0xff]  ;;  %v31_v40 = vld [vmem:[%s474_s1 + $0x38] sm:$0xff] }
  0x10   :  { %68 = vmatpush.msra.mxu0 %v42_v13  ;;  %166 = vmatpush.msra.mxu3 %v132_v27  ;;  %v113_v37 = vld [vmem:[%s476_s3 + $0x48] sm:$0xff]  ;;  %v112_v41 = vld [vmem:[%s476_s3 + $0x40] sm:$0xff]  ;;  %v111_v45 = vld [vmem:[%s476_s3 + $0x38] sm:$0xff] }
  0x11   :  { %88 = vmatpush.msra.mxu1 %v43_v14  ;;  %147 = vmatpush.msra.mxu2 %v115_v29  ;;  %v129_v39 = vld [vmem:[%s476_s3 + $0xc8] sm:$0xff]  ;;  %v28_v42 = vld [vmem:[%s474_s1 + $0x20] sm:$0xff]  ;;  %v26_v46 = vld [vmem:[%s474_s1 + $0x10] sm:$0xff] }
  0x12   :  { %69 = vmatpush.msra.mxu0 %v40_v17  ;;  %167 = vmatpush.msra.mxu3 %v131_v31  ;;  %v128_v43 = vld [vmem:[%s476_s3 + $0xc0] sm:$0xff]  ;;  %v29_v44 = vld [vmem:[%s474_s1 + $0x28] sm:$0xff]  ;;  %v127_v47 = vld [vmem:[%s476_s3 + $0xb8] sm:$0xff] }
  0x13   :  { %89 = vmatpush.msra.mxu1 %v41_v20  ;;  %148 = vmatpush.msra.mxu2 %v114_v33  ;;  %v27_v48 = vld [vmem:[%s474_s1 + $0x18] sm:$0xff]  ;;  %v110_v49 = vld [vmem:[%s476_s3 + $0x30] sm:$0xff]  ;;  %v24_v50 = vld [vmem:[%s474_s1] sm:$0xff] }
  0x14   :  { %70 = vmatpush.msra.mxu0 %v38_v22  ;;  %168 = vmatpush.msra.mxu3 %v130_v35  ;;  %v126_v51 = vld [vmem:[%s476_s3 + $0xb0] sm:$0xff]  ;;  %v23_v52 = vld [vmem:[%s473_s0] sm:$0xff]  ;;  %v25_v53 = vld [vmem:[%s474_s1 + $0x8] sm:$0xff] }
  0x15   :  { %90 = vmatpush.msra.mxu1 %v39_v24  ;;  %149 = vmatpush.msra.mxu2 %v113_v37  ;;  %v109_v54 = vld [vmem:[%s476_s3 + $0x28] sm:$0xff]  ;;  %v108_v56 = vld [vmem:[%s476_s3 + $0x20] sm:$0xff]  ;;  %v107_v58 = vld [vmem:[%s476_s3 + $0x18] sm:$0xff] }
  0x16   :  { %71 = vmatpush.msra.mxu0 %v36_v26  ;;  %169 = vmatpush.msra.mxu3 %v129_v39  ;;  %v125_v55 = vld [vmem:[%s476_s3 + $0xa8] sm:$0xff]  ;;  %v124_v57 = vld [vmem:[%s476_s3 + $0xa0] sm:$0xff]  ;;  %v106_v59 = vld [vmem:[%s476_s3 + $0x10] sm:$0xff] }
  0x17   :  { %91 = vmatpush.msra.mxu1 %v37_v28  ;;  %150 = vmatpush.msra.mxu2 %v112_v41  ;;  %v123_v60 = vld [vmem:[%s476_s3 + $0x98] sm:$0xff]  ;;  %v105_v61 = vld [vmem:[%s476_s3 + $0x8] sm:$0xff]  ;;  %v122_v62 = vld [vmem:[%s476_s3 + $0x90] sm:$0xff] }
  0x18   :  { %72 = vmatpush.msra.mxu0 %v34_v30  ;;  %170 = vmatpush.msra.mxu3 %v128_v43  ;;  %v104_v63 = vld [vmem:[%s476_s3] sm:$0xff]  ;;  %v121_v0 = vld [vmem:[%s476_s3 + $0x88] sm:$0xff] }
  0x19   :  { %92 = vmatpush.msra.mxu1 %v35_v32  ;;  %151 = vmatpush.msra.mxu2 %v111_v45  ;;  %v120_v1 = vld [vmem:[%s476_s3 + $0x80] sm:$0xff] }
  0x1a   :  { %73 = vmatpush.msra.mxu0 %v32_v34  ;;  %171 = vmatpush.msra.mxu3 %v127_v47  ;;  %v208_v2 = vld [vmem:[#allocation2] ss:$0 sm:$0xff] }
  0x1b   :  { %93 = vmatpush.msra.mxu1 %v33_v36  ;;  %152 = vmatpush.msra.mxu2 %v110_v49  ;;  %v56_v4 = vld [vmem:[%s475_s2] sm:$0x3] }
  0x1c   :  { %74 = vmatpush.msra.mxu0 %v30_v38  ;;  %172 = vmatpush.msra.mxu3 %v126_v51  ;;  %v58_v5 = vperm.slane %v56_v4, 0  ;;  %v59_v6 = vperm.slane %v56_v4, 1 }
  0x1d   :  { %94 = vmatpush.msra.mxu1 %v31_v40  ;;  %153 = vmatpush.msra.mxu2 %v109_v54 }
  0x1e   :  { %75 = vmatpush.msra.mxu0 %v28_v42  ;;  %173 = vmatpush.msra.mxu3 %v125_v55 }
  0x1f   :  { %95 = vmatpush.msra.mxu1 %v29_v44  ;;  %154 = vmatpush.msra.mxu2 %v108_v56 }
  0x20   :  { %76 = vmatpush.msra.mxu0 %v26_v46  ;;  %174 = vmatpush.msra.mxu3 %v124_v57 }
  0x21   :  { %96 = vmatpush.msra.mxu1 %v27_v48  ;;  %155 = vmatpush.msra.mxu2 %v107_v58 }
  0x22   :  { %77 = vmatpush.msra.mxu0 %v24_v50  ;;  %175 = vmatpush.msra.mxu3 %v123_v60 }
  0x23   :  { %78 = vmatmul.f32.vlgmr.msra.gmra.mxu0 %v23_v52  ;;  %97 = vmatpush.msra.mxu1 %v25_v53 }
  0x24   :  { %98 = vmatmul.f32.vlgmr.msra.gmra.mxu1 %v23_v52  ;;  %156 = vmatpush.msra.mxu2 %v106_v59 }
  0x25   :  { %176 = vmatpush.msra.mxu3 %v122_v62  ;;  %140 = vperm.xlu0 %207, %v208_v2  }
  0x26   :  { %157 = vmatpush.msra.mxu2 %v105_v61 }
  0x27   :  { %177 = vmatpush.msra.mxu3 %v121_v0 }
  0x28   :  { %158 = vmatpush.msra.mxu2 %v104_v63 }
  0x29   :  { %178 = vmatpush.msra.mxu3 %v120_v1 }
  0x97   :  { %v141_v13 = vpop.permute.xlu0 %140 }
  0xa0   :  { %v79_v7 = vpop.f32.mrf.mxu0 }
  0xa1   :  { %v80_v8 = vadd.f32 %v79_v7, %v58_v5  ;;  %v99_v9 = vpop.f32.mrf.mxu1 }
  0xa2   :  { %v100_v10 = vadd.f32 %v99_v9, %v59_v6 }
  0xa3   :  { %v102_v11 = vmax.f32 %v80_v8, 0.0 }
  0xa4   :  { %v103_v12 = vmax.f32 %v100_v10, 0.0 }
  0xa5   :  { %159 = vmatmul.f32.vlgmr.msra.gmra.mxu2 %v102_v11 }
  0xa6   :  { %179 = vmatmul.f32.vlgmr.msra.gmra.mxu3 %v103_v12 }
 0x128   :  { %v160_v14 = vpop.f32.mrf.mxu2 }
 0x129   :  { %v161_v15 = vadd.f32 %v160_v14, %v141_v13  ;;  %v180_v16 = vpop.f32.mrf.mxu3 }
 0x12b   :  { %v181_v17 = vadd.f32 %v180_v16, %v161_v15 }
 0x12d   :  { %184 = vst.msk [vmem:[#allocation3] sm:$0xff] %vm183_vm0, %v181_v17 }
 0x12e   :  { %188 = vsyncadd [#allocation4], 112  ;;  %s191_s20 = sshll.u32 %s478_s5, 4  ;;  %s236_s21 = smov [#allocation3]   ;;  %s192_s20 = int_to_ptr.hbm [resolvable:$true] %s191_s20 }
 0x12f   :  { %s189_s22 = sshll.u32 %s236_s21, 4  ;;  %s237_s23 = smov 16   ;;  %s190_s22 = int_to_ptr.vmem [resolvable:$true] %s189_s22 }
 0x130   :  { %s238_s24 = smov 1  }
 0x131   :  { %197 = dma.vmem_to_hbm [thread:$0]  %s190_s22, 16, %s192_s20, [#allocation4], %s237_s23, %s237_s23, %s238_s24  }
 0x132   :  { %233 = dma.done.wait [#allocation4], 128  }
 0x133   :  { %234 = vsyncadd [#allocation4], 4294967168 }
 0x134   :  { %202 = vsyncpa [#allocation4], 1 }

</bundles_post_ra>
